<compile_context>
chip_gen: v5e
topology: v5e:2x2
jax: 0.10.0
libtpu: 0.0.40
codegen_flags: <defaults>
</compile_context>

<pallas_src>
import functools

import jax
import jax.numpy as jnp
from jax.experimental import pallas as pl
from jax.experimental.pallas import tpu as pltpu


EPS = 1e-6
_MIB = 1024 * 1024


# --------------------------------------------------------------------------- #
# Hardware probing helpers
# --------------------------------------------------------------------------- #
def _device_kind():
    try:
        return jax.devices()[0].device_kind.lower()
    except Exception:
        return ""


def _is_v5e():
    k = _device_kind()
    return ("v5 lite" in k) or ("v5e" in k) or ("v5litepod" in k)


def _vmem_limit_bytes():
    """Per-generation scoped-VMEM limit: ~48 MiB on 64 MiB parts (v7x),
    ~100 MiB on 128 MiB parts (v4/v5e/v6e)."""
    kind = _device_kind()
    try:
        cap = int(pltpu.get_tpu_info().vmem_capacity_bytes)
    except Exception:
        cap = 64 * _MIB if "v7" in kind else 128 * _MIB
    if "v7" in kind or cap <= 64 * _MIB:
        return min(48 * _MIB, max(16 * _MIB, int(cap * 0.75)))
    if cap >= 96 * _MIB:
        return 100 * _MIB
    return max(16 * _MIB, int(cap * 0.75))


def _round_up(n, m):
    return ((n + m - 1) // m) * m


# --------------------------------------------------------------------------- #
# Kernel-side LayerNorm (single pass, torch semantics)
# --------------------------------------------------------------------------- #
def _layernorm_rows(r, gamma, beta, d_real):
    """r: (TM, Dp) f32, pad columns exactly zero.  Unbiased (N-1) std, eps added
    to std, single pass over r (sum + sum-of-squares, f32 sums)."""
    s1 = jnp.sum(r, axis=-1, keepdims=True)
    s2 = jnp.sum(r * r, axis=-1, keepdims=True)       # independent XLU reductions
    mean = s1 * (1.0 / d_real)
    var = (s2 - d_real * mean * mean) * (1.0 / (d_real - 1))
    var = jnp.maximum(var, 0.0)                       # guard E[x^2]-E[x]^2 cancel
    denom = jnp.sqrt(var) + EPS
    inv = pl.reciprocal(denom, approx=True)           # EUP slot (nearly free)
    inv = inv * (2.0 - denom * inv)                   # one Newton step -> full f32
    return (r - mean) * inv * gamma + beta


# --------------------------------------------------------------------------- #
# Kernel 1: weight fully VMEM-resident (small / medium d_model)
# --------------------------------------------------------------------------- #
def _resident_kernel(x_ref, w_ref, b_ref, gamma_ref, beta_ref, o_ref, *, d_real):
    x = x_ref[...]                                     # (TM, Dp) native dtype
    # Linear(d_model, d_model): MXU consumes the native dtype, f32 accumulation.
    y = jnp.dot(x, w_ref[...], preferred_element_type=jnp.float32)
    # Dropout is identity at inference; residual add in f32.
    r = x.astype(jnp.float32) + y + b_ref[...].astype(jnp.float32)
    out = _layernorm_rows(r,
                          gamma_ref[...].astype(jnp.float32),
                          beta_ref[...].astype(jnp.float32),
                          d_real)
    o_ref[...] = out.astype(o_ref.dtype)


# --------------------------------------------------------------------------- #
# Kernel 2: weight K-tiled over the contraction dim (large d_model, e.g. v7x)
# --------------------------------------------------------------------------- #
def _ktiled_kernel(x_ref, w_ref, b_ref, gamma_ref, beta_ref, o_ref, acc_ref,
                   *, d_real, tk):
    k = pl.program_id(1)

    @pl.when(k == 0)
    def _():
        acc_ref[...] = jnp.zeros_like(acc_ref)

    x = x_ref[...]                                     # (TM, tk) chunk of x cols
    acc_ref[...] += jnp.dot(x, w_ref[...], preferred_element_type=jnp.float32)
    # Residual: add this x chunk to the matching (128-aligned) accumulator cols.
    start = pl.multiple_of(k * tk, 128)
    acc_ref[:, pl.ds(start, tk)] += x.astype(jnp.float32)

    @pl.when(k == pl.num_programs(1) - 1)
    def _():
        r = acc_ref[...] + b_ref[...].astype(jnp.float32)
        out = _layernorm_rows(r,
                              gamma_ref[...].astype(jnp.float32),
                              beta_ref[...].astype(jnp.float32),
                              d_real)
        o_ref[...] = out.astype(o_ref.dtype)


# --------------------------------------------------------------------------- #
# Wrapper
# --------------------------------------------------------------------------- #
def residual_block(x, w, b, gamma, beta, *, tm_target=512, mxu_bf16=None):
    """x: (batch, seq, d_model); w: (d_model, d_model) stored so y = x @ w + b
    (i.e. w = W^T of the torch Linear).  Returns LayerNorm(x + (x @ w + b))."""
    batch, seq, d_model = x.shape
    rows = batch * seq
    out_dtype = x.dtype

    # v5e: feed the MXU bf16 operands (f32 MXU there is a fraction of peak and
    # doubles HBM/VMEM traffic).  LayerNorm statistics stay f32 in-kernel.
    if mxu_bf16 is None:
        mxu_bf16 = _is_v5e() and x.dtype == jnp.float32
    in_dtype = jnp.bfloat16 if mxu_bf16 else x.dtype

    d_pad = _round_up(d_model, 128)                    # lane-dense feature dim

    x2 = x.reshape(rows, d_model).astype(in_dtype)
    w2 = w.astype(in_dtype)
    if d_pad != d_model:
        # Zero column padding is neutral for the matmul / residual and adds 0 to
        # the single-pass LayerNorm sums; padded output cols are sliced off.
        x2 = jnp.pad(x2, ((0, 0), (0, d_pad - d_model)))
        w2 = jnp.pad(w2, ((0, d_pad - d_model), (0, d_pad - d_model)))

    def pad_vec(v):
        v = v.reshape(1, d_model).astype(jnp.float32)
        if d_pad != d_model:
            v = jnp.pad(v, ((0, 0), (0, d_pad - d_model)))
        return v

    b2, g2, bt2 = pad_vec(b), pad_vec(gamma), pad_vec(beta)

    x_item = jnp.dtype(in_dtype).itemsize
    w_item = jnp.dtype(in_dtype).itemsize
    o_item = jnp.dtype(out_dtype).itemsize
    row_align = max(8, 8 * (4 // x_item))              # 8 f32 / 16 bf16 / 32 int8

    vmem_limit = _vmem_limit_bytes()
    vmem_budget = vmem_limit - 6 * _MIB                # compiler / DMA headroom
    vec_bytes = 2 * 3 * d_pad * 4                      # bias/gamma/beta (generous)

    w_bytes = d_pad * d_pad * w_item                   # Buffered(1): 1x resident
    use_ktile = w_bytes > vmem_budget // 2             # weight too big to keep

    if not use_ktile:
        # ---- resident-weight path -------------------------------------------
        big_vmem = vmem_limit >= 96 * _MIB
        n_x_buf = 3 if (big_vmem and d_pad <= 512) else 2   # hide DMA latency at
        # small d_model; disabled below when the grid is too short to matter.
        # Per-TM-row VMEM: x buffers + out double buffer + ~3 f32 intermediates.
        per_row = d_pad * (n_x_buf * x_item + 2 * o_item + 3 * 4)
        avail = vmem_budget - w_bytes - vec_bytes
        tm_max = max(row_align, avail // per_row)
        tm = int(min(tm_target, tm_max, _round_up(rows, row_align)))
        tm = max(row_align, (tm // row_align) * row_align)

        grid = (pl.cdiv(rows, tm),)
        if grid[0] < 3:
            n_x_buf = 2

        if n_x_buf != 2:
            x_spec = pl.BlockSpec((tm, d_pad), lambda i: (i, 0),
                                  pipeline_mode=pl.Buffered(n_x_buf))
        else:
            x_spec = pl.BlockSpec((tm, d_pad), lambda i: (i, 0))

        const = lambda i: (0, 0)
        in_specs = [
            x_spec,                                                    # x tiles
            pl.BlockSpec((d_pad, d_pad), const, pipeline_mode=pl.Buffered(1)),
            pl.BlockSpec((1, d_pad), const, pipeline_mode=pl.Buffered(1)),
            pl.BlockSpec((1, d_pad), const, pipeline_mode=pl.Buffered(1)),
            pl.BlockSpec((1, d_pad), const, pipeline_mode=pl.Buffered(1)),
        ]
        out_spec = pl.BlockSpec((tm, d_pad), lambda i: (i, 0))
        kernel = functools.partial(_resident_kernel, d_real=d_model)
        scratch = []
        semantics = ("parallel",)
    else:
        # ---- K-tiled weight path (large d_model, 64 MiB VMEM on v7x) --------
        # tk: largest 128-multiple divisor of d_pad whose double-buffered weight
        # chunk fits ~1/3 of the budget (must divide d_pad exactly so no ragged
        # garbage enters the accumulator).
        n128 = d_pad // 128
        tk = 128
        for nb in range(n128, 0, -1):
            if n128 % nb:
                continue
            cand = nb * 128
            if 2 * cand * d_pad * w_item <= vmem_budget // 3:
                tk = cand
                break
        w_chunk = 2 * tk * d_pad * w_item
        per_row = (2 * tk * x_item          # x chunk double buffer
                   + 2 * d_pad * o_item     # out double buffer
                   + d_pad * 4              # f32 accumulator scratch
                   + 2 * d_pad * 4)         # f32 intermediates at finalize
        avail = vmem_budget - w_chunk - vec_bytes
        tm_max = max(row_align, avail // per_row)
        tm = int(min(tm_target, tm_max, _round_up(rows, row_align)))
        tm = max(row_align, (tm // row_align) * row_align)

        grid = (pl.cdiv(rows, tm), d_pad // tk)
        const2 = lambda i, k: (0, 0)
        in_specs = [
            pl.BlockSpec((tm, tk), lambda i, k: (i, k)),               # x chunks
            pl.BlockSpec((tk, d_pad), lambda i, k: (k, 0)),            # w chunks
            pl.BlockSpec((1, d_pad), const2, pipeline_mode=pl.Buffered(1)),
            pl.BlockSpec((1, d_pad), const2, pipeline_mode=pl.Buffered(1)),
            pl.BlockSpec((1, d_pad), const2, pipeline_mode=pl.Buffered(1)),
        ]
        out_spec = pl.BlockSpec((tm, d_pad), lambda i, k: (i, 0))
        kernel = functools.partial(_ktiled_kernel, d_real=d_model, tk=tk)
        scratch = [pltpu.VMEM((tm, d_pad), jnp.float32)]
        semantics = ("parallel", "arbitrary")

    # Rows are never padded: grid uses cdiv and the ragged last tile's OOB rows
    # are garbage-in / dropped-on-store (rows are independent).
    out = pl.pallas_call(
        kernel,
        out_shape=jax.ShapeDtypeStruct((rows, d_pad), out_dtype),
        grid_spec=pltpu.PrefetchScalarGridSpec(
            num_scalar_prefetch=0,
            grid=grid,
            in_specs=in_specs,
            out_specs=out_spec,
            scratch_shapes=scratch,
        ),
        compiler_params=pltpu.CompilerParams(
            dimension_semantics=semantics,
            vmem_limit_bytes=vmem_limit,
        ),
    )(x2, w2, b2, g2, bt2)

    if d_pad != d_model:
        out = out[:, :d_model]
    return out.reshape(batch, seq, d_model)


# --------------------------------------------------------------------------- #
# Pure-JAX reference (matches the PyTorch module)
# --------------------------------------------------------------------------- #
def reference(x, w, b, gamma, beta):
    y = jnp.einsum("bsd,de->bse", x, w) + b
    r = x + y
    mean = jnp.mean(r, axis=-1, keepdims=True)
    c = r - mean
    std = jnp.sqrt(jnp.sum(c * c, axis=-1, keepdims=True) / (r.shape[-1] - 1))
    return gamma * c / (std + EPS) + beta


if __name__ == "__main__":
    key = jax.random.PRNGKey(0)
    batch, seq, d_model = 2, 8, 128

    k_x, k_w, k_b = jax.random.split(key, 3)
    x = jax.random.normal(k_x, (batch, seq, d_model), dtype=jnp.float32)
    # Linear(d_model, d_model) params, stored so y = x @ w + b  (w = W^T)
    w = jax.random.normal(k_w, (d_model, d_model), dtype=jnp.float32) * (
        1.0 / jnp.sqrt(d_model))
    b = jax.random.normal(k_b, (d_model,), dtype=jnp.float32) * 0.01
    # LayerNorm params as in the PyTorch __init__: gamma=ones, beta=zeros
    gamma = jnp.ones((d_model,), dtype=jnp.float32)
    beta = jnp.zeros((d_model,), dtype=jnp.float32)

    out = jax.block_until_ready(residual_block(x, w, b, gamma, beta))
    ref = reference(x, w, b, gamma, beta)

    # On v5e the wrapper auto-casts the MXU operands to bf16; loosen tolerance.
    tol = 5e-2 if _is_v5e() else 1e-4
    assert out.shape == ref.shape, "shape mismatch vs reference"
    assert jnp.allclose(out, ref, atol=tol, rtol=tol), "mismatch vs reference"

    print("KERNEL_OK")
</pallas_src>

<mosaic_0001>
module attributes {stable_mosaic.version = 11 : i64} {
  func.func @_resident_kernel(%arg0: i32, %arg1: memref<16x128xf32, #tpu.memory_space<vmem>>, %arg2: memref<128x128xf32, #tpu.memory_space<vmem>>, %arg3: memref<1x128xf32, #tpu.memory_space<vmem>>, %arg4: memref<1x128xf32, #tpu.memory_space<vmem>>, %arg5: memref<1x128xf32, #tpu.memory_space<vmem>>, %arg6: memref<16x128xf32, #tpu.memory_space<vmem>>) attributes {dimension_semantics = [#tpu.dimension_semantics<parallel>], iteration_bounds = array<i64: 1>, scalar_prefetch = 0 : i64, scratch_operands = 0 : i64, tpu.core_type = #tpu.core_type<tc>, window_params = [{transform_indices = @transform_0, window_bounds = array<i64: 16, 128>}, {pipeline_mode = #tpu.pipeline_mode<synchronous>, transform_indices = @transform_1, window_bounds = array<i64: 128, 128>}, {pipeline_mode = #tpu.pipeline_mode<synchronous>, transform_indices = @transform_2, window_bounds = array<i64: 1, 128>}, {pipeline_mode = #tpu.pipeline_mode<synchronous>, transform_indices = @transform_3, window_bounds = array<i64: 1, 128>}, {pipeline_mode = #tpu.pipeline_mode<synchronous>, transform_indices = @transform_4, window_bounds = array<i64: 1, 128>}, {transform_indices = @transform_5, window_bounds = array<i64: 16, 128>}]} {
    %c0 = arith.constant 0 : index
    %c0_0 = arith.constant 0 : index
    %0 = vector.load %arg1[%c0, %c0_0] : memref<16x128xf32, #tpu.memory_space<vmem>>, vector<16x128xf32>
    %c0_1 = arith.constant 0 : index
    %c0_2 = arith.constant 0 : index
    %1 = vector.load %arg2[%c0_1, %c0_2] : memref<128x128xf32, #tpu.memory_space<vmem>>, vector<128x128xf32>
    %cst = arith.constant dense<0.000000e+00> : vector<16x128xf32>
    %2 = tpu.matmul %0, %1, %cst {dimension_numbers = #tpu.dot_dimension_numbers<[1], [0], [0], [1], [0, 0, 1, 1], [], []>} : vector<16x128xf32>, vector<128x128xf32>, vector<16x128xf32> -> vector<16x128xf32>
    %3 = arith.addf %0, %2 : vector<16x128xf32>
    %c0_3 = arith.constant 0 : index
    %c0_4 = arith.constant 0 : index
    %4 = vector.load %arg3[%c0_3, %c0_4] : memref<1x128xf32, #tpu.memory_space<vmem>>, vector<1x128xf32>
    %5 = vector.broadcast %4 : vector<1x128xf32> to vector<16x128xf32>
    %6 = arith.addf %3, %5 : vector<16x128xf32>
    %c0_5 = arith.constant 0 : index
    %c0_6 = arith.constant 0 : index
    %7 = vector.load %arg4[%c0_5, %c0_6] : memref<1x128xf32, #tpu.memory_space<vmem>>, vector<1x128xf32>
    %c0_7 = arith.constant 0 : index
    %c0_8 = arith.constant 0 : index
    %8 = vector.load %arg5[%c0_7, %c0_8] : memref<1x128xf32, #tpu.memory_space<vmem>>, vector<1x128xf32>
    %cst_9 = arith.constant dense<0.000000e+00> : vector<16xf32>
    %9 = vector.multi_reduction <add>, %6, %cst_9 [1] : vector<16x128xf32> to vector<16xf32>
    %10 = vector.shape_cast %9 : vector<16xf32> to vector<16x1xf32>
    %11 = arith.mulf %6, %6 : vector<16x128xf32>
    %cst_10 = arith.constant dense<0.000000e+00> : vector<16xf32>
    %12 = vector.multi_reduction <add>, %11, %cst_10 [1] : vector<16x128xf32> to vector<16xf32>
    %13 = vector.shape_cast %12 : vector<16xf32> to vector<16x1xf32>
    %cst_11 = arith.constant 7.812500e-03 : f32
    %14 = vector.broadcast %cst_11 : f32 to vector<16x1xf32>
    %15 = arith.mulf %10, %14 : vector<16x1xf32>
    %cst_12 = arith.constant 1.280000e+02 : f32
    %16 = vector.broadcast %cst_12 : f32 to vector<16x1xf32>
    %17 = arith.mulf %16, %15 : vector<16x1xf32>
    %18 = arith.mulf %17, %15 : vector<16x1xf32>
    %19 = arith.subf %13, %18 : vector<16x1xf32>
    %cst_13 = arith.constant 0.00787401571 : f32
    %20 = vector.broadcast %cst_13 : f32 to vector<16x1xf32>
    %21 = arith.mulf %19, %20 : vector<16x1xf32>
    %cst_14 = arith.constant 0.000000e+00 : f32
    %22 = vector.broadcast %cst_14 : f32 to vector<16x1xf32>
    %23 = arith.maximumf %21, %22 : vector<16x1xf32>
    %24 = math.sqrt %23 : vector<16x1xf32>
    %cst_15 = arith.constant 9.99999997E-7 : f32
    %25 = vector.broadcast %cst_15 : f32 to vector<16x1xf32>
    %26 = arith.addf %24, %25 : vector<16x1xf32>
    %27 = tpu.reciprocal %26 {approx = true} : vector<16x1xf32> -> vector<16x1xf32>
    %28 = arith.mulf %26, %27 : vector<16x1xf32>
    %cst_16 = arith.constant 2.000000e+00 : f32
    %29 = vector.broadcast %cst_16 : f32 to vector<16x1xf32>
    %30 = arith.subf %29, %28 : vector<16x1xf32>
    %31 = arith.mulf %27, %30 : vector<16x1xf32>
    %32 = vector.broadcast %15 : vector<16x1xf32> to vector<16x128xf32>
    %33 = arith.subf %6, %32 : vector<16x128xf32>
    %34 = vector.broadcast %31 : vector<16x1xf32> to vector<16x128xf32>
    %35 = arith.mulf %33, %34 : vector<16x128xf32>
    %36 = vector.broadcast %7 : vector<1x128xf32> to vector<16x128xf32>
    %37 = arith.mulf %35, %36 : vector<16x128xf32>
    %38 = vector.broadcast %8 : vector<1x128xf32> to vector<16x128xf32>
    %39 = arith.addf %37, %38 : vector<16x128xf32>
    %c0_17 = arith.constant 0 : index
    %c0_18 = arith.constant 0 : index
    %40 = vector.load %arg6[%c0_17, %c0_18] : memref<16x128xf32, #tpu.memory_space<vmem>>, vector<16x128xf32>
    tpu.vector_store %arg6[%c0_17, %c0_18], %39 {strides = array<i32>} : memref<16x128xf32, #tpu.memory_space<vmem>>, vector<16x128xf32>,
    return
  }
  func.func @transform_0(%arg0: i32) -> (i32, i32) {
    %c0_i32 = arith.constant 0 : i32
    %c0_i32_0 = arith.constant 0 : i32
    return %arg0, %c0_i32 : i32, i32
  }
  func.func @transform_1(%arg0: i32) -> (i32, i32) {
    %c0_i32 = arith.constant 0 : i32
    %c0_i32_0 = arith.constant 0 : i32
    %c0_i32_1 = arith.constant 0 : i32
    return %c0_i32, %c0_i32_0 : i32, i32
  }
  func.func @transform_2(%arg0: i32) -> (i32, i32) {
    %c0_i32 = arith.constant 0 : i32
    %c0_i32_0 = arith.constant 0 : i32
    %c0_i32_1 = arith.constant 0 : i32
    return %c0_i32, %c0_i32_0 : i32, i32
  }
  func.func @transform_3(%arg0: i32) -> (i32, i32) {
    %c0_i32 = arith.constant 0 : i32
    %c0_i32_0 = arith.constant 0 : i32
    %c0_i32_1 = arith.constant 0 : i32
    return %c0_i32, %c0_i32_0 : i32, i32
  }
  func.func @transform_4(%arg0: i32) -> (i32, i32) {
    %c0_i32 = arith.constant 0 : i32
    %c0_i32_0 = arith.constant 0 : i32
    %c0_i32_1 = arith.constant 0 : i32
    return %c0_i32, %c0_i32_0 : i32, i32
  }
  func.func @transform_5(%arg0: i32) -> (i32, i32) {
    %c0_i32 = arith.constant 0 : i32
    %c0_i32_0 = arith.constant 0 : i32
    return %arg0, %c0_i32 : i32, i32
  }
}

</mosaic_0001>

<bundles_post_ra>
// kernel: tpu_custom_call.1
= control target key start
LH: loop header
LB: loop body
LE: loop exit
PB: predicated region body
PF: predicated region fallthrough
CT: control target
= control target key end

     0   :  { %10 = vsyncpa [#allocation3], 0  ;;  %s374_s0 = inlined_call_operand.hbm [shape: f32[16,128], index: 0, kind: input, shape index: {}]   ;;  %s375_s1 = inlined_call_operand.hbm [shape: f32[128,128], index: 1, kind: input, shape index: {}]   ;;  %s376_s2 = inlined_call_operand.vmem [shape: f32[1,128], index: 2, kind: input, shape index: {}]   ;;  %s377_s3 = inlined_call_operand.vmem [shape: f32[1,128], index: 3, kind: input, shape index: {}]   ;;  %s378_s4 = inlined_call_operand.vmem [shape: f32[1,128], index: 4, kind: input, shape index: {}]   ;;  %s379_s5 = inlined_call_operand.hbm [shape: f32[16,128], index: 5, kind: output, shape index: {}]  }
   0x1   :  { %11 = vsyncpa [#allocation6], 0 }
   0x2   :  { %12 = vsyncpa [#allocation4], 0  ;;  %s17_s20 = sshll.u32 %s374_s0, 4  ;;  %s306_s21 = smov [#allocation2]   ;;  %s18_s20 = int_to_ptr.hbm [resolvable:$true] %s17_s20 }
   0x3   :  { %s19_s22 = sshll.u32 %s306_s21, 4  ;;  %s30_s25 = sshll.u32 %s375_s1, 4  ;;  %s20_s22 = int_to_ptr.vmem [resolvable:$true] %s19_s22  ;;  %s31_s25 = int_to_ptr.hbm [resolvable:$true] %s30_s25 }
   0x4   :  { %s307_s26 = smov 128   ;;  %s308_s27 = smov 8  }
   0x5   :  { %25 = dma.hbm_to_vmem [thread:$0]  %s18_s20, 256, %s20_s22, [#allocation3], %s307_s26, %s307_s26, %s308_s27  }
   0x6   :  { %s309_s28 = smov [#allocation5]  }
   0x7   :  { %s32_s29 = sshll.u32 %s309_s28, 4  ;;  %s33_s29 = int_to_ptr.vmem [resolvable:$true] %s32_s29 }
   0x8   :  { %38 = dma.hbm_to_vmem [thread:$0]  %s31_s25, 2048, %s33_s29, [#allocation6], %s307_s26, %s307_s26, %s308_s27  }
   0x9   :  { %300 = dma.done.wait [#allocation3], 256  }
   0xa   :  { %301 = vsyncadd [#allocation3], 4294967040 }
   0xb   :  { %302 = dma.done.wait [#allocation6], 2048  }
   0xc   :  { %303 = vsyncadd [#allocation6], 4294965248  ;;  %v70_v0 = vld [vmem:[#allocation5 + $0x78] sm:$0xff]  ;;  %v69_v1 = vld [vmem:[#allocation5 + $0x70] sm:$0xff]  ;;  %s310_s8 = smov [#allocation7]  }
   0xd   :  { %71 = vmatpush.msra.mxu0 %v70_v0  ;;  %196 = vmatpush.msra.mxu1 %v70_v0  ;;  %v68_v2 = vld [vmem:[#allocation5 + $0x68] sm:$0xff]  ;;  %v67_v3 = vld [vmem:[#allocation5 + $0x60] sm:$0xff]  ;;  %v66_v4 = vld [vmem:[#allocation5 + $0x58] sm:$0xff]  ;;  %s180_s9 = sshll.u32 %s310_s8, 4  ;;  %s181_s9 = int_to_ptr.vmem [resolvable:$true] %s180_s9 }
   0xe   :  { %v65_v5 = vld [vmem:[#allocation5 + $0x50] sm:$0xff]  ;;  %v64_v6 = vld [vmem:[#allocation5 + $0x48] sm:$0xff]  ;;  %v63_v7 = vld [vmem:[#allocation5 + $0x40] sm:$0xff] }
   0xf   :  { %72 = vmatpush.msra.mxu0 %v69_v1  ;;  %197 = vmatpush.msra.mxu1 %v69_v1  ;;  %v62_v8 = vld [vmem:[#allocation5 + $0x38] sm:$0xff]  ;;  %v61_v9 = vld [vmem:[#allocation5 + $0x30] sm:$0xff]  ;;  %v60_v10 = vld [vmem:[#allocation5 + $0x28] sm:$0xff] }
  0x10   :  { %v59_v11 = vld [vmem:[#allocation5 + $0x20] sm:$0xff]  ;;  %v58_v12 = vld [vmem:[#allocation5 + $0x18] sm:$0xff]  ;;  %v57_v13 = vld [vmem:[#allocation5 + $0x10] sm:$0xff] }
  0x11   :  { %73 = vmatpush.msra.mxu0 %v68_v2  ;;  %198 = vmatpush.msra.mxu1 %v68_v2  ;;  %v56_v14 = vld [vmem:[#allocation5 + $0x8] sm:$0xff]  ;;  %v55_v15 = vld [vmem:[#allocation5] sm:$0xff]  ;;  %v53_v16 = vld [vmem:[#allocation2] sm:$0xff] }
  0x12   :  { %v54_v17 = vld [vmem:[#allocation2 + $0x8] sm:$0xff]  ;;  %v217_v18 = vld [vmem:[%s376_s2] ss:$0 sm:$0xff] }
  0x13   :  { %74 = vmatpush.msra.mxu0 %v67_v3  ;;  %199 = vmatpush.msra.mxu1 %v67_v3 }
  0x15   :  { %75 = vmatpush.msra.mxu0 %v66_v4  ;;  %200 = vmatpush.msra.mxu1 %v66_v4 }
  0x17   :  { %76 = vmatpush.msra.mxu0 %v65_v5  ;;  %201 = vmatpush.msra.mxu1 %v65_v5 }
  0x19   :  { %77 = vmatpush.msra.mxu0 %v64_v6  ;;  %202 = vmatpush.msra.mxu1 %v64_v6  ;;  %v218_v6 = vld [vmem:[%s377_s3] ss:$0 sm:$0xff]  ;;  %s182_s3 = sshll.u32 %s379_s5, 4  ;;  %s183_s3 = int_to_ptr.hbm [resolvable:$true] %s182_s3 }
  0x1b   :  { %78 = vmatpush.msra.mxu0 %v63_v7  ;;  %203 = vmatpush.msra.mxu1 %v63_v7 }
  0x1d   :  { %79 = vmatpush.msra.mxu0 %v62_v8  ;;  %204 = vmatpush.msra.mxu1 %v62_v8  ;;  %v219_v8 = vld [vmem:[%s378_s4] ss:$0 sm:$0xff] }
  0x1f   :  { %80 = vmatpush.msra.mxu0 %v61_v9  ;;  %205 = vmatpush.msra.mxu1 %v61_v9 }
  0x21   :  { %81 = vmatpush.msra.mxu0 %v60_v10  ;;  %206 = vmatpush.msra.mxu1 %v60_v10 }
  0x23   :  { %82 = vmatpush.msra.mxu0 %v59_v11  ;;  %207 = vmatpush.msra.mxu1 %v59_v11 }
  0x25   :  { %83 = vmatpush.msra.mxu0 %v58_v12  ;;  %208 = vmatpush.msra.mxu1 %v58_v12 }
  0x27   :  { %84 = vmatpush.msra.mxu0 %v57_v13  ;;  %209 = vmatpush.msra.mxu1 %v57_v13 }
  0x29   :  { %85 = vmatpush.msra.mxu0 %v56_v14  ;;  %210 = vmatpush.msra.mxu1 %v56_v14 }
  0x2b   :  { %86 = vmatpush.msra.mxu0 %v55_v15  ;;  %211 = vmatpush.msra.mxu1 %v55_v15 }
  0x2c   :  { %87 = vmatmul.f32.vlgmr.msra.gmra.mxu0 %v53_v16  ;;  %90 = vmatmul.f32.vlgmr.msra.gmra.mxu1 %v54_v17 }
  0xa9   :  { %v88_v19 = vpop.f32.mrf.mxu0  ;;  %v91_v20 = vpop.f32.mrf.mxu1 }
  0xaa   :  { %v94_v21 = vadd.f32 %v88_v19, %v53_v16  ;;  %v95_v23 = vadd.f32 %v91_v20, %v54_v17 }
  0xac   :  { %v100_v22 = vadd.f32 %v217_v18, %v94_v21  ;;  %v356_v25 = vadd.f32 %v217_v18, %v95_v23 }
  0xae   :  { %104 = vadd.xlane.f32.xlu0 %v100_v22  ;;  %v108_v24 = vmul.f32 %v100_v22, %v100_v22  ;;  %v109_v26 = vmul.f32 %v356_v25, %v356_v25 }
  0xb0   :  { %110 = vadd.xlane.f32.xlu1 %v108_v24 }
  0xb6   :  { %106 = vadd.xlane.f32.xlu0 %v356_v25 }
  0xb8   :  { %112 = vadd.xlane.f32.xlu1 %v109_v26 }
 0x121   :  { %v105_v27 = vpop.xlane.xlu0 %104 }
 0x122   :  { %v114_v28 = vmul.f32 0.0078125, %v105_v27 }
 0x123   :  { %v111_v30 = vpop.xlane.xlu1 %110 }
 0x124   :  { %v116_v29 = vmul.f32 128.0, %v114_v28  ;;  %v160_v4 = vsub.f32 %v100_v22, %v114_v28 }
 0x126   :  { %v118_v31 = vmul.f32 %v116_v29, %v114_v28 }
 0x128   :  { %v120_v32 = vsub.f32 %v111_v30, %v118_v31 }
 0x129   :  { %v107_v33 = vpop.xlane.xlu0 %106 }
 0x12a   :  { %v122_v34 = vmul.f32 0.007874016, %v120_v32  ;;  %v115_v35 = vmul.f32 0.0078125, %v107_v33 }
 0x12b   :  { %v113_v39 = vpop.xlane.xlu1 %112 }
 0x12c   :  { %v124_v36 = vmax.f32 %v122_v34, 0.0  ;;  %v117_v37 = vmul.f32 128.0, %v115_v35  ;;  %v161_v14 = vsub.f32 %v356_v25, %v115_v35 }
 0x12e   :  { %220 = vrsqrt.f32 %v124_v36  ;;  %v119_v38 = vmul.f32 %v117_v37, %v115_v35  ;;  %vm133_vm0 = vcmp.eq.f32.partialorder %v124_v36, inf  ;;  %v136_v53 = vand.u32 2147483648, %v124_v36 }
 0x12f   :  { %vm135_vm1 = vcmp.eq.f32.partialorder %v124_v36, 0.0 }
 0x130   :  { %v121_v40 = vsub.f32 %v113_v39, %v119_v38 }
 0x132   :  { %v123_v41 = vmul.f32 0.007874016, %v121_v40 }
 0x134   :  { %v221_v42 = vpop.eup %220  ;;  %v125_v43 = vmax.f32 %v123_v41, 0.0 }
 0x135   :  { %v127_v44 = vmul.f32 %v221_v42, %v124_v36 }
 0x136   :  { %222 = vrsqrt.f32 %v125_v43  ;;  %vm145_vm2 = vcmp.eq.f32.partialorder %v125_v43, inf  ;;  %v148_v61 = vand.u32 2147483648, %v125_v43  ;;  %vm147_vm3 = vcmp.eq.f32.partialorder %v125_v43, 0.0 }
 0x137   :  { %v128_v45 = vmul.f32 %v221_v42, %v127_v44 }
 0x139   :  { %v129_v46 = vmul.f32 0.5, %v128_v45 }
 0x13b   :  { %v130_v47 = vsub.f32 1.5, %v129_v46 }
 0x13c   :  { %v223_v48 = vpop.eup %222 }
 0x13d   :  { %v139_v49 = vmul.f32 %v223_v48, %v125_v43  ;;  %v131_v50 = vmul.f32 %v221_v42, %v130_v47 }
 0x13f   :  { %v140_v51 = vmul.f32 %v223_v48, %v139_v49  ;;  %v132_v52 = vmul.f32 %v131_v50, %v124_v36 }
 0x141   :  { %v141_v54 = vmul.f32 0.5, %v140_v51  ;;  %v134_v55 = vsel %vm133_vm0, %v124_v36, %v132_v52 }
 0x142   :  { %v137_v56 = vsel %vm135_vm1, %v136_v53, %v134_v55 }
 0x143   :  { %v142_v57 = vsub.f32 1.5, %v141_v54  ;;  %v150_v58 = vadd.f32 1e-06, %v137_v56 }
 0x145   :  { %v143_v59 = vmul.f32 %v223_v48, %v142_v57  ;;  %224 = vrcp.f32 %v150_v58 }
 0x147   :  { %v144_v60 = vmul.f32 %v143_v59, %v125_v43 }
 0x149   :  { %v146_v62 = vsel %vm145_vm2, %v125_v43, %v144_v60 }
 0x14a   :  { %v149_v63 = vsel %vm147_vm3, %v148_v61, %v146_v62 }
 0x14b   :  { %v225_v0 = vpop.eup %224  ;;  %v151_v1 = vadd.f32 1e-06, %v149_v63 }
 0x14c   :  { %v154_v2 = vmul.f32 %v225_v0, %v150_v58 }
 0x14d   :  { %226 = vrcp.f32 %v151_v1 }
 0x14e   :  { %v156_v3 = vsub.f32 2.0, %v154_v2 }
 0x150   :  { %v158_v5 = vmul.f32 %v225_v0, %v156_v3 }
 0x152   :  { %v162_v7 = vmul.f32 %v160_v4, %v158_v5 }
 0x153   :  { %v227_v9 = vpop.eup %226 }
 0x154   :  { %v155_v10 = vmul.f32 %v227_v9, %v151_v1  ;;  %v167_v11 = vmul.f32 %v218_v6, %v162_v7 }
 0x156   :  { %v157_v12 = vsub.f32 2.0, %v155_v10  ;;  %v172_v13 = vadd.f32 %v219_v8, %v167_v11 }
 0x158   :  { %v159_v15 = vmul.f32 %v227_v9, %v157_v12  ;;  %174 = vst [vmem:[#allocation7] sm:$0xff] %v172_v13 }
 0x15a   :  { %v163_v16 = vmul.f32 %v161_v14, %v159_v15 }
 0x15c   :  { %v168_v17 = vmul.f32 %v218_v6, %v163_v16 }
 0x15e   :  { %v173_v18 = vadd.f32 %v219_v8, %v168_v17 }
 0x160   :  { %175 = vst [vmem:[#allocation7 + $0x8] sm:$0xff] %v173_v18 }
 0x161   :  { %188 = dma.vmem_to_hbm [thread:$0]  %s181_s9, 256, %s183_s3, [#allocation4], %s307_s26, %s307_s26, %s308_s27  }
 0x162   :  { %304 = dma.done.wait [#allocation4], 256  }
 0x163   :  { %305 = vsyncadd [#allocation4], 4294967040 }
 0x164   :  { %193 = vsyncpa [#allocation3], 1 }
 0x165   :  { %194 = vsyncpa [#allocation6], 1 }
 0x166   :  { %195 = vsyncpa [#allocation4], 1 }

</bundles_post_ra>
